<compile_context>
chip_gen: v5e
topology: v5e:2x2
jax: 0.10.0
libtpu: 0.0.40
codegen_flags: <defaults>
</compile_context>

<pallas_src>
import math

import jax
import jax.numpy as jnp
from jax.experimental import pallas as pl
from jax.experimental.pallas import tpu as pltpu

_GELU_C = math.sqrt(2.0 / math.pi)


def _round_up(x: int, m: int) -> int:
    return ((x + m - 1) // m) * m


# ----------------------------------------------------------------------------
# Device / tile heuristics
# ----------------------------------------------------------------------------

def _device_info():
    kind = ""
    try:
        kind = jax.devices()[0].device_kind.lower()
    except Exception:
        pass
    vmem = None
    try:
        vmem = int(getattr(pltpu.get_tpu_info(), "vmem_capacity_bytes", 0)) or None
    except Exception:
        vmem = None
    if vmem is None:
        vmem = (64 << 20) if "v7" in kind else (128 << 20)
    return kind, vmem


def _tile_targets(kind):
    # (tm_target, th_target, min_row_tiles)
    if "v7" in kind:
        return 512, 256, 2           # 64 MiB VMEM, 2 TCs/chip, 3.2 TB/s HBM
    if "v6" in kind:
        return 1024, 1024, 1         # needs large tm to reach the MXU roofline
    if "v5e" in kind or "v5 lite" in kind or "v5lite" in kind:
        return 384, 512, 1
    return 512, 512, 1


def _vmem_budget(vmem_phys):
    return max(min(int(vmem_phys * 0.8), vmem_phys - (16 << 20)), 8 << 20)


def _tile_vmem_bytes(tm, th, d_pad, x_it, w_it, out_it):
    # Double-buffered x / W12 / W3 / out tiles + single f32 accumulator.
    return (2 * tm * d_pad * x_it
            + 2 * d_pad * (2 * th) * w_it
            + 2 * th * d_pad * w_it
            + 2 * tm * d_pad * out_it
            + tm * d_pad * 4)


# ----------------------------------------------------------------------------
# Weight packing (hoisted out of the hot path)
# ----------------------------------------------------------------------------

def choose_hidden_tile(d, h, weight_dtype=jnp.float32, th=None):
    """Pick the hidden-dim tile used by the packed-weight layout."""
    kind, vmem_phys = _device_info()
    _, th_target, _ = _tile_targets(kind)
    d_pad = _round_up(d, 128)
    h128 = _round_up(h, 128)
    if th is None:
        th = min(_round_up(th_target, 128), h128)
        w_it = jnp.dtype(weight_dtype).itemsize
        budget = _vmem_budget(vmem_phys)
        # Leave roughly half the budget for the x / out / accumulator tiles.
        while th > 128 and 6 * d_pad * th * w_it > budget // 2:
            th = _round_up(th // 2, 128)
    return max(128, _round_up(min(th, h128), 128))


def pack_geglu_weights(w1, w2, w3, *, th=None, dtype=None):
    """Pad + pack the GEGLU weights ONCE (call at init, not per forward).

    w1, w2: (d, h)   w3: (h, d)
    Returns (w12p, w3p, th):
      w12p: (d_pad, 2*h_pad), hidden-tile-blocked layout [W1_k | W2_k | ...]
      w3p : (h_pad, d_pad)
    Pass dtype=jnp.bfloat16 for the bf16-native MXU path.
    """
    d, h = w1.shape
    assert w2.shape == (d, h) and w3.shape == (h, d)
    if dtype is not None:
        w1, w2, w3 = w1.astype(dtype), w2.astype(dtype), w3.astype(dtype)

    th = choose_hidden_tile(d, h, w1.dtype, th)
    d_pad = _round_up(d, 128)
    h_pad = _round_up(_round_up(h, 128), th)

    if (d_pad, h_pad) != (d, h):
        w1 = jnp.pad(w1, ((0, d_pad - d), (0, h_pad - h)))
        w2 = jnp.pad(w2, ((0, d_pad - d), (0, h_pad - h)))
        w3 = jnp.pad(w3, ((0, h_pad - h), (0, d_pad - d)))

    nk = h_pad // th
    w12 = jnp.concatenate(
        [w1.reshape(d_pad, nk, th), w2.reshape(d_pad, nk, th)], axis=2
    ).reshape(d_pad, 2 * h_pad)
    return w12, w3, th


# ----------------------------------------------------------------------------
# Kernel
# ----------------------------------------------------------------------------

def _geglu_kernel(x_ref, w12_ref, w3_ref, o_ref, acc_ref):
    # grid = (tokens // tm, h_pad // th); axis 1 is the lin3 reduction.
    k = pl.program_id(1)

    @pl.when(k == 0)
    def _():
        acc_ref[...] = jnp.zeros_like(acc_ref)

    th = w3_ref.shape[0]

    # Fused gate+up projection: one MXU pass over the packed [W1_k | W2_k] tile.
    h12 = jnp.dot(x_ref[...], w12_ref[...], preferred_element_type=jnp.float32)
    h1 = h12[:, :th]            # lane-aligned slice (th % 128 == 0)
    h2 = h12[:, th:]

    # tanh-approx GELU exactly as in the reference module (coefficient 0.44715).
    g = 0.5 * h1 * (1.0 + jnp.tanh(_GELU_C * (h1 + 0.44715 * (h1 * h1 * h1))))
    h = (g * h2).astype(w3_ref.dtype)

    # lin3: accumulate this hidden tile's partial product in f32.
    acc_ref[...] += jnp.dot(h, w3_ref[...], preferred_element_type=jnp.float32)

    @pl.when(k == pl.num_programs(1) - 1)
    def _():
        o_ref[...] = acc_ref[...].astype(o_ref.dtype)


# ----------------------------------------------------------------------------
# Forward wrappers
# ----------------------------------------------------------------------------

def geglu_apply(x, w12p, w3p, th, *, tm=None, vmem_limit_bytes=None):
    """Run the GEGLU FFN with pre-packed weights.  x: (..., d)."""
    orig_shape = x.shape
    d = orig_shape[-1]
    d_pad, two_h_pad = w12p.shape
    h_pad = two_h_pad // 2
    assert w3p.shape == (h_pad, d_pad)
    assert d <= d_pad and d_pad % 128 == 0 and th % 128 == 0 and h_pad % th == 0

    out_dtype = x.dtype
    x2 = x.reshape(-1, d)
    # The packed weights define the matmul dtype (bf16 path if packed as bf16).
    if x2.dtype != w12p.dtype:
        x2 = x2.astype(w12p.dtype)
    m = x2.shape[0]

    x_it = jnp.dtype(x2.dtype).itemsize
    w_it = jnp.dtype(w12p.dtype).itemsize
    out_it = jnp.dtype(out_dtype).itemsize
    sub = 16 if x_it < 4 else 8       # sublane packing for bf16

    kind, vmem_phys = _device_info()
    budget = _vmem_budget(vmem_phys)
    tm_target, _, min_row_tiles = _tile_targets(kind)

    m_sub = _round_up(max(m, sub), sub)
    auto_tm = tm is None
    if auto_tm:
        tm = min(_round_up(tm_target, sub), m_sub)
    tm = _round_up(max(sub, min(tm, m_sub)), sub)

    # v7x: keep both TensorCores busy for small-m (decode) shapes.
    if auto_tm and min_row_tiles > 1 and m_sub // tm < min_row_tiles:
        want = _round_up(-(-m_sub // min_row_tiles), sub)
        if sub <= want < tm:
            tm = want

    # Shrink tm until the tile footprint fits the VMEM budget (th is fixed by
    # the packed-weight layout).
    while tm > sub and _tile_vmem_bytes(tm, th, d_pad, x_it, w_it, out_it) > budget:
        tm = max(sub, _round_up(tm // 2, sub))

    m_pad = _round_up(m, tm)
    if m_pad != m or d_pad != d:
        xp = jnp.pad(x2, ((0, m_pad - m), (0, d_pad - d)))
    else:
        xp = x2

    grid = (m_pad // tm, h_pad // th)

    usage = _tile_vmem_bytes(tm, th, d_pad, x_it, w_it, out_it)
    if vmem_limit_bytes is None:
        vmem_limit_bytes = min(vmem_phys, usage + (16 << 20))

    # Weights are re-streamed from HBM once per row tile.
    weight_bytes = (w12p.size + w3p.size) * w_it * grid[0]
    cost = pl.CostEstimate(
        flops=int(6 * m_pad * d_pad * h_pad),
        transcendentals=int(m_pad * h_pad),
        bytes_accessed=int(m_pad * d_pad * (x_it + out_it) + weight_bytes))

    out = pl.pallas_call(
        _geglu_kernel,
        out_shape=jax.ShapeDtypeStruct((m_pad, d_pad), out_dtype),
        grid_spec=pltpu.PrefetchScalarGridSpec(
            num_scalar_prefetch=0,
            grid=grid,
            in_specs=[
                pl.BlockSpec((tm, d_pad), lambda i, k: (i, 0)),        # x tile
                pl.BlockSpec((d_pad, 2 * th), lambda i, k: (0, k)),    # [W1_k|W2_k]
                pl.BlockSpec((th, d_pad), lambda i, k: (k, 0)),        # W3_k
            ],
            out_specs=pl.BlockSpec((tm, d_pad), lambda i, k: (i, 0)),
            scratch_shapes=[pltpu.VMEM((tm, d_pad), jnp.float32)],
        ),
        compiler_params=pltpu.CompilerParams(
            dimension_semantics=("parallel", "arbitrary"),
            vmem_limit_bytes=int(vmem_limit_bytes)),
        cost_estimate=cost,
    )(xp, w12p, w3p)

    return out[:m, :d].reshape(orig_shape)


def feed_forward_geglu(x, w1, w2, w3, *, th=None, tm=None, dtype=None,
                       vmem_limit_bytes=None):
    """Convenience wrapper: packs weights per call, then runs the kernel.

    For production, call pack_geglu_weights() once at init and geglu_apply()
    per forward so weight padding/packing stays off the hot path.
    """
    w12p, w3p, th = pack_geglu_weights(w1, w2, w3, th=th, dtype=dtype)
    return geglu_apply(x, w12p, w3p, th, tm=tm, vmem_limit_bytes=vmem_limit_bytes)


# ----------------------------------------------------------------------------
# Reference + self-test
# ----------------------------------------------------------------------------

def _reference(x, w1, w2, w3):
    h1 = x @ w1
    h2 = x @ w2
    g = 0.5 * h1 * (1.0 + jnp.tanh(_GELU_C * (h1 + 0.44715 * h1 ** 3)))
    return (g * h2) @ w3


if __name__ == "__main__":
    # Module config: dim=32, multiplier=4 -> hidden = 4 * ceil(32/4) = 32
    dim = 32
    multiplier = 4
    hidden = multiplier * ((dim + multiplier - 1) // multiplier)
    batch, seq = 2, 8

    key = jax.random.PRNGKey(0)
    kx, k1, k2, k3 = jax.random.split(key, 4)

    x = jax.random.normal(kx, (batch, seq, dim), dtype=jnp.float32)
    # Deterministic "Linear" weights, stored as (in, out) for the kernel.
    w1 = jax.random.normal(k1, (dim, hidden), dtype=jnp.float32) * 0.05
    w2 = jax.random.normal(k2, (dim, hidden), dtype=jnp.float32) * 0.05
    w3 = jax.random.normal(k3, (hidden, dim), dtype=jnp.float32) * 0.05

    # Production path: pack once, apply many times.
    w12p, w3p, th = pack_geglu_weights(w1, w2, w3)
    out = jax.block_until_ready(geglu_apply(x, w12p, w3p, th))

    # Convenience path (packs per call).
    out2 = jax.block_until_ready(feed_forward_geglu(x, w1, w2, w3))

    ref = _reference(x.reshape(-1, dim), w1, w2, w3).reshape(x.shape)
    assert out.shape == x.shape
    assert jnp.allclose(out, ref, atol=1e-5, rtol=1e-5)
    assert jnp.allclose(out2, ref, atol=1e-5, rtol=1e-5)

    print("KERNEL_OK")
</pallas_src>

<mosaic_0001>
module attributes {stable_mosaic.version = 11 : i64} {
  func.func @_geglu_kernel(%arg0: i32, %arg1: i32, %arg2: memref<16x128xf32, #tpu.memory_space<vmem>>, %arg3: memref<128x256xf32, #tpu.memory_space<vmem>>, %arg4: memref<128x128xf32, #tpu.memory_space<vmem>>, %arg5: memref<16x128xf32, #tpu.memory_space<vmem>>, %arg6: memref<16x128xf32, #tpu.memory_space<vmem>>) attributes {dimension_semantics = [#tpu.dimension_semantics<parallel>, #tpu.dimension_semantics<arbitrary>], iteration_bounds = array<i64: 1, 1>, scalar_prefetch = 0 : i64, scratch_operands = 1 : i64, tpu.core_type = #tpu.core_type<tc>, window_params = [{transform_indices = @transform_0, window_bounds = array<i64: 16, 128>}, {transform_indices = @transform_1, window_bounds = array<i64: 128, 256>}, {transform_indices = @transform_2, window_bounds = array<i64: 128, 128>}, {transform_indices = @transform_3, window_bounds = array<i64: 16, 128>}]} {
    %c0_i32 = arith.constant 0 : i32
    %0 = arith.cmpi eq, %arg1, %c0_i32 : i32
    %1 = arith.extui %0 : i1 to i32
    %c0_i32_0 = arith.constant 0 : i32
    %2 = arith.cmpi ne, %1, %c0_i32_0 : i32
    scf.if %2 {
      %cst_17 = arith.constant 0.000000e+00 : f32
      %30 = vector.broadcast %cst_17 : f32 to vector<16x128xf32>
      %c0_18 = arith.constant 0 : index
      %c0_19 = arith.constant 0 : index
      %31 = vector.load %arg6[%c0_18, %c0_19] : memref<16x128xf32, #tpu.memory_space<vmem>>, vector<16x128xf32>
      tpu.vector_store %arg6[%c0_18, %c0_19], %30 {strides = array<i32>} : memref<16x128xf32, #tpu.memory_space<vmem>>, vector<16x128xf32>,
    } else {
    }
    %c0 = arith.constant 0 : index
    %c0_1 = arith.constant 0 : index
    %3 = vector.load %arg2[%c0, %c0_1] : memref<16x128xf32, #tpu.memory_space<vmem>>, vector<16x128xf32>
    %c0_2 = arith.constant 0 : index
    %c0_3 = arith.constant 0 : index
    %4 = vector.load %arg3[%c0_2, %c0_3] : memref<128x256xf32, #tpu.memory_space<vmem>>, vector<128x256xf32>
    %cst = arith.constant dense<0.000000e+00> : vector<16x256xf32>
    %5 = tpu.matmul %3, %4, %cst {dimension_numbers = #tpu.dot_dimension_numbers<[1], [0], [0], [1], [0, 0, 1, 1], [], []>} : vector<16x128xf32>, vector<128x256xf32>, vector<16x256xf32> -> vector<16x256xf32>
    %6 = vector.extract_strided_slice %5 {offsets = [0, 0], sizes = [16, 128], strides = [1, 1]} : vector<16x256xf32> to vector<16x128xf32>
    %7 = vector.extract_strided_slice %5 {offsets = [0, 128], sizes = [16, 128], strides = [1, 1]} : vector<16x256xf32> to vector<16x128xf32>
    %cst_4 = arith.constant 5.000000e-01 : f32
    %8 = vector.broadcast %cst_4 : f32 to vector<16x128xf32>
    %9 = arith.mulf %8, %6 : vector<16x128xf32>
    %10 = arith.mulf %6, %6 : vector<16x128xf32>
    %11 = arith.mulf %10, %6 : vector<16x128xf32>
    %cst_5 = arith.constant 4.471500e-01 : f32
    %12 = vector.broadcast %cst_5 : f32 to vector<16x128xf32>
    %13 = arith.mulf %12, %11 : vector<16x128xf32>
    %14 = arith.addf %6, %13 : vector<16x128xf32>
    %cst_6 = arith.constant 0.797884583 : f32
    %15 = vector.broadcast %cst_6 : f32 to vector<16x128xf32>
    %16 = arith.mulf %15, %14 : vector<16x128xf32>
    %17 = math.tanh %16 : vector<16x128xf32>
    %cst_7 = arith.constant 1.000000e+00 : f32
    %18 = vector.broadcast %cst_7 : f32 to vector<16x128xf32>
    %19 = arith.addf %18, %17 : vector<16x128xf32>
    %20 = arith.mulf %9, %19 : vector<16x128xf32>
    %21 = arith.mulf %20, %7 : vector<16x128xf32>
    %c0_8 = arith.constant 0 : index
    %c0_9 = arith.constant 0 : index
    %22 = vector.load %arg6[%c0_8, %c0_9] : memref<16x128xf32, #tpu.memory_space<vmem>>, vector<16x128xf32>
    %c0_10 = arith.constant 0 : index
    %c0_11 = arith.constant 0 : index
    %23 = vector.load %arg4[%c0_10, %c0_11] : memref<128x128xf32, #tpu.memory_space<vmem>>, vector<128x128xf32>
    %cst_12 = arith.constant dense<0.000000e+00> : vector<16x128xf32>
    %24 = tpu.matmul %21, %23, %cst_12 {dimension_numbers = #tpu.dot_dimension_numbers<[1], [0], [0], [1], [0, 0, 1, 1], [], []>} : vector<16x128xf32>, vector<128x128xf32>, vector<16x128xf32> -> vector<16x128xf32>
    %25 = arith.addf %22, %24 : vector<16x128xf32>
    %c0_13 = arith.constant 0 : index
    %c0_14 = arith.constant 0 : index
    %26 = vector.load %arg6[%c0_13, %c0_14] : memref<16x128xf32, #tpu.memory_space<vmem>>, vector<16x128xf32>
    tpu.vector_store %arg6[%c0_13, %c0_14], %25 {strides = array<i32>} : memref<16x128xf32, #tpu.memory_space<vmem>>, vector<16x128xf32>,
    %c0_i32_15 = arith.constant 0 : i32
    %27 = arith.cmpi eq, %arg1, %c0_i32_15 : i32
    %28 = arith.extui %27 : i1 to i32
    %c0_i32_16 = arith.constant 0 : i32
    %29 = arith.cmpi ne, %28, %c0_i32_16 : i32
    scf.if %29 {
      %c0_17 = arith.constant 0 : index
      %c0_18 = arith.constant 0 : index
      %30 = vector.load %arg6[%c0_17, %c0_18] : memref<16x128xf32, #tpu.memory_space<vmem>>, vector<16x128xf32>
      %c0_19 = arith.constant 0 : index
      %c0_20 = arith.constant 0 : index
      %31 = vector.load %arg5[%c0_19, %c0_20] : memref<16x128xf32, #tpu.memory_space<vmem>>, vector<16x128xf32>
      tpu.vector_store %arg5[%c0_19, %c0_20], %30 {strides = array<i32>} : memref<16x128xf32, #tpu.memory_space<vmem>>, vector<16x128xf32>,
    } else {
    }
    return
  }
  func.func @transform_0(%arg0: i32, %arg1: i32) -> (i32, i32) {
    %c0_i32 = arith.constant 0 : i32
    %c0_i32_0 = arith.constant 0 : i32
    return %arg0, %c0_i32 : i32, i32
  }
  func.func @transform_1(%arg0: i32, %arg1: i32) -> (i32, i32) {
    %c0_i32 = arith.constant 0 : i32
    %c0_i32_0 = arith.constant 0 : i32
    return %c0_i32, %arg1 : i32, i32
  }
  func.func @transform_2(%arg0: i32, %arg1: i32) -> (i32, i32) {
    %c0_i32 = arith.constant 0 : i32
    %c0_i32_0 = arith.constant 0 : i32
    return %arg1, %c0_i32 : i32, i32
  }
  func.func @transform_3(%arg0: i32, %arg1: i32) -> (i32, i32) {
    %c0_i32 = arith.constant 0 : i32
    %c0_i32_0 = arith.constant 0 : i32
    return %arg0, %c0_i32 : i32, i32
  }
}

</mosaic_0001>

<bundles_post_ra>
// kernel: tpu_custom_call.1
= control target key start
LH: loop header
LB: loop body
LE: loop exit
PB: predicated region body
PF: predicated region fallthrough
CT: control target
= control target key end

     0   :  { %8 = vsyncpa [#allocation4], 0  ;;  %s419_s0 = inlined_call_operand.hbm [shape: f32[16,128], index: 0, kind: input, shape index: {}]   ;;  %s420_s1 = inlined_call_operand.hbm [shape: f32[128,256], index: 1, kind: input, shape index: {}]   ;;  %s421_s2 = inlined_call_operand.hbm [shape: f32[128,128], index: 2, kind: input, shape index: {}]   ;;  %s422_s3 = inlined_call_operand.hbm [shape: f32[16,128], index: 3, kind: output, shape index: {}]  }
   0x1   :  { %9 = vsyncpa [#allocation7], 0  ;;  %s28_s14 = sshll.u32 %s420_s1, 4  ;;  %s29_s14 = int_to_ptr.hbm [resolvable:$true] %s28_s14 }
   0x2   :  { %10 = vsyncpa [#allocation5], 0  ;;  %s370_s15 = smov [#allocation6]   ;;  %s15_s19 = sshll.u32 %s419_s0, 4  ;;  %s16_s19 = int_to_ptr.hbm [resolvable:$true] %s15_s19 }
   0x3   :  { %s30_s16 = sshll.u32 %s370_s15, 4  ;;  %s371_s20 = smov 256   ;;  %s31_s16 = int_to_ptr.vmem [resolvable:$true] %s30_s16 }
   0x4   :  { %s372_s21 = smov 16   ;;  %s373_s22 = smov [#allocation3]  }
   0x5   :  { %36 = dma.hbm_to_vmem [thread:$0]  %s29_s14, 4096, %s31_s16, [#allocation7], %s371_s20, %s371_s20, %s372_s21  }
   0x6   :  { %s17_s23 = sshll.u32 %s373_s22, 4  ;;  %s374_s24 = smov 128   ;;  %s18_s23 = int_to_ptr.vmem [resolvable:$true] %s17_s23 }
   0x7   :  { %s375_s25 = smov 8   ;;  %s41_s27 = sshll.u32 %s421_s2, 4  ;;  %s42_s27 = int_to_ptr.hbm [resolvable:$true] %s41_s27 }
   0x8   :  { %23 = dma.hbm_to_vmem [thread:$0]  %s16_s19, 256, %s18_s23, [#allocation4], %s374_s24, %s374_s24, %s375_s25  }
   0x9   :  { %s376_s28 = smov [#allocation8]  }
   0xa   :  { %s43_s0 = sshll.u32 %s376_s28, 4  ;;  %s44_s0 = int_to_ptr.vmem [resolvable:$true] %s43_s0 }
   0xb   :  { %49 = dma.hbm_to_vmem [thread:$0]  %s42_s27, 2048, %s44_s0, [#allocation7], %s374_s24, %s374_s24, %s375_s25  }
   0xc   :  { %364 = dma.done.wait [#allocation4], 256  }
   0xd   :  { %365 = vsyncadd [#allocation4], 4294967040 }
   0xe   :  { %366 = dma.done.wait [#allocation7], 6144  }
   0xf   :  { %367 = vsyncadd [#allocation7], 4294961152  ;;  %v100_v0 = vld [vmem:[#allocation6 + $0xf0] sm:$0xff]  ;;  %v98_v1 = vld [vmem:[#allocation6 + $0xe0] sm:$0xff]  ;;  %s377_s2 = smov [#allocation9]   ;;  %s226_s5 = sshll.u32 %s422_s3, 4  ;;  %s227_s5 = int_to_ptr.hbm [resolvable:$true] %s226_s5 }
  0x10   :  { %102 = vmatpush.msra.mxu0 %v100_v0  ;;  %240 = vmatpush.msra.mxu3 %v100_v0  ;;  %v96_v2 = vld [vmem:[#allocation6 + $0xd0] sm:$0xff]  ;;  %v101_v3 = vld [vmem:[#allocation6 + $0xf8] sm:$0xff]  ;;  %v94_v4 = vld [vmem:[#allocation6 + $0xc0] sm:$0xff]  ;;  %s224_s29 = sshll.u32 %s377_s2, 4  ;;  %s225_s29 = int_to_ptr.vmem [resolvable:$true] %s224_s29 }
  0x11   :  { %125 = vmatpush.msra.mxu1 %v101_v3  ;;  %v99_v5 = vld [vmem:[#allocation6 + $0xe8] sm:$0xff]  ;;  %v97_v6 = vld [vmem:[#allocation6 + $0xd8] sm:$0xff]  ;;  %v92_v7 = vld [vmem:[#allocation6 + $0xb0] sm:$0xff] }
  0x12   :  { %103 = vmatpush.msra.mxu0 %v98_v1  ;;  %241 = vmatpush.msra.mxu3 %v98_v1  ;;  %v95_v8 = vld [vmem:[#allocation6 + $0xc8] sm:$0xff]  ;;  %v90_v9 = vld [vmem:[#allocation6 + $0xa0] sm:$0xff]  ;;  %v93_v10 = vld [vmem:[#allocation6 + $0xb8] sm:$0xff] }
  0x13   :  { %126 = vmatpush.msra.mxu1 %v99_v5  ;;  %v88_v11 = vld [vmem:[#allocation6 + $0x90] sm:$0xff]  ;;  %v91_v12 = vld [vmem:[#allocation6 + $0xa8] sm:$0xff]  ;;  %v86_v13 = vld [vmem:[#allocation6 + $0x80] sm:$0xff] }
  0x14   :  { %104 = vmatpush.msra.mxu0 %v96_v2  ;;  %242 = vmatpush.msra.mxu3 %v96_v2  ;;  %v185_v14 = vld [vmem:[#allocation8 + $0x78] sm:$0xff]  ;;  %v184_v16 = vld [vmem:[#allocation8 + $0x70] sm:$0xff]  ;;  %v87_v18 = vld [vmem:[#allocation6 + $0x88] sm:$0xff] }
  0x15   :  { %127 = vmatpush.msra.mxu1 %v97_v6  ;;  %v89_v15 = vld [vmem:[#allocation6 + $0x98] sm:$0xff]  ;;  %v84_v17 = vld [vmem:[#allocation6 + $0x70] sm:$0xff]  ;;  %186 = vmatpush.msra.mxu2 %v185_v14  ;;  %v183_v19 = vld [vmem:[#allocation8 + $0x68] sm:$0xff] }
  0x16   :  { %105 = vmatpush.msra.mxu0 %v94_v4  ;;  %243 = vmatpush.msra.mxu3 %v94_v4  ;;  %v82_v20 = vld [vmem:[#allocation6 + $0x60] sm:$0xff]  ;;  %v85_v21 = vld [vmem:[#allocation6 + $0x78] sm:$0xff]  ;;  %v80_v23 = vld [vmem:[#allocation6 + $0x50] sm:$0xff] }
  0x17   :  { %128 = vmatpush.msra.mxu1 %v95_v8  ;;  %187 = vmatpush.msra.mxu2 %v184_v16  ;;  %v182_v22 = vld [vmem:[#allocation8 + $0x60] sm:$0xff]  ;;  %v83_v24 = vld [vmem:[#allocation6 + $0x68] sm:$0xff]  ;;  %v81_v26 = vld [vmem:[#allocation6 + $0x58] sm:$0xff] }
  0x18   :  { %106 = vmatpush.msra.mxu0 %v92_v7  ;;  %244 = vmatpush.msra.mxu3 %v92_v7  ;;  %v78_v25 = vld [vmem:[#allocation6 + $0x40] sm:$0xff]  ;;  %v76_v27 = vld [vmem:[#allocation6 + $0x30] sm:$0xff]  ;;  %v79_v28 = vld [vmem:[#allocation6 + $0x48] sm:$0xff] }
  0x19   :  { %129 = vmatpush.msra.mxu1 %v93_v10  ;;  %188 = vmatpush.msra.mxu2 %v183_v19  ;;  %v74_v29 = vld [vmem:[#allocation6 + $0x20] sm:$0xff]  ;;  %v77_v30 = vld [vmem:[#allocation6 + $0x38] sm:$0xff]  ;;  %v72_v31 = vld [vmem:[#allocation6 + $0x10] sm:$0xff] }
  0x1a   :  { %107 = vmatpush.msra.mxu0 %v90_v9  ;;  %245 = vmatpush.msra.mxu3 %v90_v9  ;;  %v75_v32 = vld [vmem:[#allocation6 + $0x28] sm:$0xff]  ;;  %v70_v33 = vld [vmem:[#allocation6] sm:$0xff]  ;;  %v68_v34 = vld [vmem:[#allocation3] sm:$0xff] }
  0x1b   :  { %130 = vmatpush.msra.mxu1 %v91_v12  ;;  %189 = vmatpush.msra.mxu2 %v182_v22  ;;  %v69_v35 = vld [vmem:[#allocation3 + $0x8] sm:$0xff]  ;;  %v71_v37 = vld [vmem:[#allocation6 + $0x8] sm:$0xff]  ;;  %v180_v39 = vld [vmem:[#allocation8 + $0x50] sm:$0xff] }
  0x1c   :  { %108 = vmatpush.msra.mxu0 %v88_v11  ;;  %246 = vmatpush.msra.mxu3 %v88_v11  ;;  %v73_v36 = vld [vmem:[#allocation6 + $0x18] sm:$0xff]  ;;  %v179_v40 = vld [vmem:[#allocation8 + $0x48] sm:$0xff]  ;;  %v178_v41 = vld [vmem:[#allocation8 + $0x40] sm:$0xff] }
  0x1d   :  { %131 = vmatpush.msra.mxu1 %v89_v15  ;;  %v181_v38 = vld [vmem:[#allocation8 + $0x58] sm:$0xff]  ;;  %v176_v43 = vld [vmem:[#allocation8 + $0x30] sm:$0xff]  ;;  %v175_v44 = vld [vmem:[#allocation8 + $0x28] sm:$0xff] }
  0x1e   :  { %109 = vmatpush.msra.mxu0 %v86_v13  ;;  %247 = vmatpush.msra.mxu3 %v86_v13  ;;  %v177_v42 = vld [vmem:[#allocation8 + $0x38] sm:$0xff]  ;;  %v174_v45 = vld [vmem:[#allocation8 + $0x20] sm:$0xff]  ;;  %v172_v47 = vld [vmem:[#allocation8 + $0x10] sm:$0xff] }
  0x1f   :  { %132 = vmatpush.msra.mxu1 %v87_v18  ;;  %190 = vmatpush.msra.mxu2 %v181_v38  ;;  %v173_v46 = vld [vmem:[#allocation8 + $0x18] sm:$0xff]  ;;  %v171_v48 = vld [vmem:[#allocation8 + $0x8] sm:$0xff]  ;;  %v170_v49 = vld [vmem:[#allocation8] sm:$0xff] }
  0x20   :  { %110 = vmatpush.msra.mxu0 %v84_v17  ;;  %248 = vmatpush.msra.mxu3 %v84_v17 }
  0x21   :  { %133 = vmatpush.msra.mxu1 %v85_v21  ;;  %191 = vmatpush.msra.mxu2 %v180_v39 }
  0x22   :  { %111 = vmatpush.msra.mxu0 %v82_v20  ;;  %249 = vmatpush.msra.mxu3 %v82_v20 }
  0x23   :  { %134 = vmatpush.msra.mxu1 %v83_v24  ;;  %192 = vmatpush.msra.mxu2 %v179_v40 }
  0x24   :  { %112 = vmatpush.msra.mxu0 %v80_v23  ;;  %250 = vmatpush.msra.mxu3 %v80_v23 }
  0x25   :  { %135 = vmatpush.msra.mxu1 %v81_v26  ;;  %193 = vmatpush.msra.mxu2 %v178_v41 }
  0x26   :  { %113 = vmatpush.msra.mxu0 %v78_v25  ;;  %251 = vmatpush.msra.mxu3 %v78_v25 }
  0x27   :  { %136 = vmatpush.msra.mxu1 %v79_v28  ;;  %194 = vmatpush.msra.mxu2 %v177_v42 }
  0x28   :  { %114 = vmatpush.msra.mxu0 %v76_v27  ;;  %252 = vmatpush.msra.mxu3 %v76_v27 }
  0x29   :  { %137 = vmatpush.msra.mxu1 %v77_v30  ;;  %195 = vmatpush.msra.mxu2 %v176_v43 }
  0x2a   :  { %115 = vmatpush.msra.mxu0 %v74_v29  ;;  %253 = vmatpush.msra.mxu3 %v74_v29 }
  0x2b   :  { %138 = vmatpush.msra.mxu1 %v75_v32  ;;  %196 = vmatpush.msra.mxu2 %v175_v44 }
  0x2c   :  { %116 = vmatpush.msra.mxu0 %v72_v31  ;;  %254 = vmatpush.msra.mxu3 %v72_v31 }
  0x2d   :  { %139 = vmatpush.msra.mxu1 %v73_v36  ;;  %197 = vmatpush.msra.mxu2 %v174_v45 }
  0x2e   :  { %117 = vmatpush.msra.mxu0 %v70_v33  ;;  %255 = vmatpush.msra.mxu3 %v70_v33 }
  0x2f   :  { %118 = vmatmul.f32.vlgmr.msra.gmra.mxu0 %v68_v34  ;;  %121 = vmatmul.f32.vlgmr.msra.gmra.mxu3 %v69_v35 }
  0x30   :  { %140 = vmatpush.msra.mxu1 %v71_v37  ;;  %198 = vmatpush.msra.mxu2 %v173_v46 }
  0x31   :  { %141 = vmatmul.f32.vlgmr.msra.gmra.mxu1 %v68_v34 }
  0x32   :  { %199 = vmatpush.msra.mxu2 %v172_v47 }
  0x34   :  { %200 = vmatpush.msra.mxu2 %v171_v48 }
  0x36   :  { %201 = vmatpush.msra.mxu2 %v170_v49 }
  0x39   :  { %144 = vmatmul.f32.gmra.mxu1 %v69_v35 }
  0xac   :  { %v119_v50 = vpop.f32.mrf.mxu0 }
  0xad   :  { %v150_v51 = vmul.f32 %v119_v50, %v119_v50  ;;  %v148_v0 = vmul.f32 0.5, %v119_v50 }
  0xae   :  { %v142_v63 = vpop.f32.mrf.mxu1 }
  0xaf   :  { %v152_v52 = vmul.f32 %v150_v51, %v119_v50 }
  0xb1   :  { %v154_v53 = vmul.f32 0.44715, %v152_v52 }
  0xb2   :  { %v122_v54 = vpop.f32.mrf.mxu3 }
  0xb3   :  { %v156_v55 = vadd.f32 %v154_v53, %v119_v50  ;;  %v151_v56 = vmul.f32 %v122_v54, %v122_v54  ;;  %v149_v5 = vmul.f32 0.5, %v122_v54 }
  0xb5   :  { %v158_v57 = vmul.f32 0.7978846, %v156_v55  ;;  %v153_v58 = vmul.f32 %v151_v56, %v122_v54 }
  0xb6   :  { %v145_v8 = vpop.f32.mrf.mxu1 }
  0xb7   :  { %264 = vtanh.f32 %v158_v57  ;;  %v155_v59 = vmul.f32 0.44715, %v153_v58 }
  0xb9   :  { %v157_v60 = vadd.f32 %v155_v59, %v122_v54 }
  0xbb   :  { %v159_v61 = vmul.f32 0.7978846, %v157_v60 }
  0xbd   :  { %v265_v62 = vpop.eup %264  ;;  %266 = vtanh.f32 %v159_v61 }
  0xbe   :  { %v162_v1 = vadd.f32 1.0, %v265_v62 }
  0xc0   :  { %v164_v2 = vmul.f32 %v162_v1, %v148_v0 }
  0xc2   :  { %v166_v3 = vmul.f32 %v164_v2, %v142_v63 }
  0xc3   :  { %v267_v4 = vpop.eup %266 }
  0xc4   :  { %202 = vmatmul.f32.vlgmr.msra.gmra.mxu2 %v166_v3  ;;  %v163_v6 = vadd.f32 1.0, %v267_v4 }
  0xc6   :  { %v165_v7 = vmul.f32 %v163_v6, %v149_v5 }
  0xc8   :  { %v167_v9 = vmul.f32 %v165_v7, %v145_v8 }
  0xcc   :  { %205 = vmatmul.f32.gmra.mxu2 %v167_v9 }
 0x147   :  { %v203_v10 = vpop.f32.mrf.mxu2 }
 0x148   :  { %218 = vst [vmem:[#allocation9] sm:$0xff] %v203_v10 }
 0x14f   :  { %v206_v11 = vpop.f32.mrf.mxu2 }
 0x150   :  { %219 = vst [vmem:[#allocation9 + $0x8] sm:$0xff] %v206_v11 }
 0x151   :  { %232 = dma.vmem_to_hbm [thread:$0]  %s225_s29, 256, %s227_s5, [#allocation5], %s374_s24, %s374_s24, %s375_s25  }
 0x152   :  { %368 = dma.done.wait [#allocation5], 256  }
 0x153   :  { %369 = vsyncadd [#allocation5], 4294967040 }
 0x154   :  { %237 = vsyncpa [#allocation4], 1 }
 0x155   :  { %238 = vsyncpa [#allocation7], 1 }
 0x156   :  { %239 = vsyncpa [#allocation5], 1 }

</bundles_post_ra>
